<compile_context>
chip_gen: v7x
topology: tpu7x:2x2x1
jax: 0.10.0
libtpu: 0.0.40
codegen_flags: <defaults>
</compile_context>

<pallas_src>
import functools

import jax
import jax.numpy as jnp
import numpy as np
from jax import lax
from jax.experimental import pallas as pl
from jax.experimental.pallas import tpu as pltpu


def _round_up(x, m):
    return (x + m - 1) // m * m


def _temporal_block_kernel(K, D, P, L, packed,
                           x_ref, w1_ref, b1_ref, w2_ref, b2_ref,
                           wd_ref, bd_ref, o_ref):
    """One batch tile per grid step.  No scratch: everything stays in values.

    packed path : x_ref (Bt, L, Cp)    conv1 taps packed into lanes by wrapper
    general path: x_ref (Bt, L+P, Ci)  causally left-padded by wrapper
    w1_ref (Cp|K*Ci, Co), w2_ref (K*Co, Co), wd_ref (Cp|Ci, Co)  compute dtype
    b*_ref (1, Co) f32; o_ref (Bt, L, Co) lane-dense output.
    """
    Bt = x_ref.shape[0]
    Co = o_ref.shape[-1]
    cdtype = x_ref.dtype

    if packed:
        # lanes [k*C_in:(k+1)*C_in] of x hold x[t - (K-1-k)*D]; one deep dot.
        xm = x_ref[...].reshape(Bt * L, x_ref.shape[-1])
        acc1 = jnp.dot(xm, w1_ref[...], preferred_element_type=jnp.float32)
        # residual 1x1 conv: wd is zero outside the shift-0 tap rows, so the
        # full-depth contraction over the packed operand is exactly x[t] @ wd.
        res = jnp.dot(xm, wd_ref[...],
                      preferred_element_type=jnp.float32) + bd_ref[...]
    else:
        xp = x_ref[...]                                      # (Bt, L+P, Ci)
        Ci = xp.shape[-1]
        # in-kernel im2col: fuse the K dilated taps into one contraction.
        xc = jnp.concatenate([xp[:, k * D:k * D + L, :] for k in range(K)],
                             axis=-1).reshape(Bt * L, K * Ci)
        acc1 = jnp.dot(xc, w1_ref[...], preferred_element_type=jnp.float32)
        res = jnp.dot(xp[:, P:, :].reshape(Bt * L, Ci), wd_ref[...],
                      preferred_element_type=jnp.float32) + bd_ref[...]

    h1 = jnp.maximum(acc1 + b1_ref[...], 0.0)    # f32; dropout1 == identity

    # ---- conv2 (dilated, causal) ----
    # Left-pad h1 by P as a *value* (no scratch round-trip), slice the K tap
    # slabs statically and fuse them into one lane-concat contraction.
    h1b = h1.reshape(Bt, L, Co).astype(cdtype)
    if P > 0:
        h1b = jnp.concatenate([jnp.zeros((Bt, P, Co), cdtype), h1b], axis=1)
    hc = jnp.concatenate([h1b[:, k * D:k * D + L, :] for k in range(K)],
                         axis=-1).reshape(Bt * L, K * Co)
    acc2 = jnp.dot(hc, w2_ref[...], preferred_element_type=jnp.float32)
    h2 = jnp.maximum(acc2 + b2_ref[...], 0.0)    # dropout2 == identity

    out = jnp.maximum(h2 + res, 0.0)             # residual add + final ReLU
    o_ref[...] = out.reshape(Bt, L, Co).astype(o_ref.dtype)


def temporal_block(x, w1, b1, w2, b2, wd, bd, *, kernel_size, dilation,
                   batch_tile=None, compute_dtype=jnp.bfloat16,
                   out_dtype=jnp.float32):
    """x: (N, C_in, L) f32; conv weights in PyTorch layout (C_out, C_in, K)."""
    N, C_in, L = x.shape
    C_out = w1.shape[0]
    K, D = kernel_size, dilation
    P = D * (K - 1)                    # padding; Chomp1d(P) => causal conv

    Co = _round_up(C_out, 128)         # lane-dense output channels
    packed = (K * C_in) <= 128         # wrapper-side tap packing feasible

    # Batch tile: keep >= 2 grid steps when N allows, so both v7x TensorCores
    # get work and the input/output DMA pipeline can overlap with compute.
    if batch_tile is None:
        batch_tile = 8
    Bt = max(1, min(batch_tile, N))
    if N > 1:
        Bt = min(Bt, (N + 1) // 2)
    Npad = _round_up(N, Bt)

    x_t = jnp.transpose(x, (0, 2, 1))                              # (N, L, C_in)

    def prep_b(b):
        return jnp.pad(b, (0, Co - C_out)).reshape(1, Co).astype(jnp.float32)

    if packed:
        # Pack the K dilated, causally shifted taps into the lane dimension:
        # lanes [k*C_in:(k+1)*C_in] = x[t - (K-1-k)*D]  (zeros for t < shift).
        Cp = _round_up(K * C_in, 128)
        taps = []
        for k in range(K):
            s = (K - 1 - k) * D
            if s == 0:
                taps.append(x_t)
            else:
                taps.append(jnp.pad(x_t, ((0, 0), (s, 0), (0, 0)))[:, :L, :])
        x_im = jnp.concatenate(taps, axis=-1)                      # (N, L, K*C_in)
        x_p = jnp.pad(x_im, ((0, Npad - N), (0, 0),
                             (0, Cp - K * C_in))).astype(compute_dtype)
        x_block = (Bt, L, Cp)

        w1t = jnp.transpose(w1, (2, 1, 0)).reshape(K * C_in, C_out)
        w1_p = jnp.pad(w1t, ((0, Cp - K * C_in),
                             (0, Co - C_out))).astype(compute_dtype)
        # 1x1 downsample weight mapped onto the shift-0 tap rows of the packed
        # operand; all other rows are zero.
        wd_p = jnp.pad(jnp.transpose(wd[:, :, 0], (1, 0)),
                       (((K - 1) * C_in, Cp - K * C_in),
                        (0, Co - C_out))).astype(compute_dtype)
        w1_rows, wd_rows = Cp, Cp
    else:
        # General path: fold the causal left-pad of x into the same jnp.pad
        # that already pads batch and channels (no in-kernel scratch pad).
        Ci = _round_up(C_in, 128)
        x_p = jnp.pad(x_t, ((0, Npad - N), (P, 0),
                            (0, Ci - C_in))).astype(compute_dtype)  # (Npad, L+P, Ci)
        x_block = (Bt, L + P, Ci)

        w1t = jnp.pad(jnp.transpose(w1, (2, 1, 0)),
                      ((0, 0), (0, Ci - C_in), (0, Co - C_out)))
        w1_p = w1t.reshape(K * Ci, Co).astype(compute_dtype)
        wd_p = jnp.pad(jnp.transpose(wd[:, :, 0], (1, 0)),
                       ((0, Ci - C_in), (0, Co - C_out))).astype(compute_dtype)
        w1_rows, wd_rows = K * Ci, Ci

    w2t = jnp.pad(jnp.transpose(w2, (2, 1, 0)),
                  ((0, 0), (0, Co - C_out), (0, Co - C_out)))
    w2_p = w2t.reshape(K * Co, Co).astype(compute_dtype)
    b1_p, b2_p, bd_p = prep_b(b1), prep_b(b2), prep_b(bd)

    # Grid-invariant operands: single-buffer (their index_map is constant, so
    # double-buffering them is pure VMEM waste).
    single = pl.Buffered(1)

    # Rough VMEM budget (double-buffered x/out, single-buffered weights,
    # matmul/activation temporaries); keep it explicit so v7x (64 MiB) is safe.
    itemc = jnp.dtype(compute_dtype).itemsize
    itemo = jnp.dtype(out_dtype).itemsize
    x_blk_bytes = Bt * x_block[1] * x_block[2] * itemc
    o_blk_bytes = Bt * L * Co * itemo
    w_bytes = (w1_rows + K * Co + wd_rows) * Co * itemc + 3 * Co * 4
    tmp_bytes = (Bt * (L + P) * Co + Bt * L * K * Co) * itemc + 4 * Bt * L * Co * 4
    vmem_need = 2 * (x_blk_bytes + o_blk_bytes) + w_bytes + tmp_bytes
    vmem_limit = int(min(64 * 1024 * 1024, max(32 * 1024 * 1024, 2 * vmem_need)))

    flops = 2 * Npad * L * (w1_rows + K * Co + wd_rows) * Co
    bytes_accessed = (Npad * x_block[1] * x_block[2] * itemc
                      + Npad * L * Co * itemo + w_bytes)
    cost = pl.CostEstimate(flops=int(flops), transcendentals=0,
                           bytes_accessed=int(bytes_accessed))

    kernel = functools.partial(_temporal_block_kernel, K, D, P, L, packed)
    out = pl.pallas_call(
        kernel,
        out_shape=jax.ShapeDtypeStruct((Npad, L, Co), out_dtype),
        grid_spec=pltpu.PrefetchScalarGridSpec(
            num_scalar_prefetch=0,
            grid=(Npad // Bt,),
            in_specs=[
                pl.BlockSpec(x_block, lambda n: (n, 0, 0)),
                pl.BlockSpec((w1_rows, Co), lambda n: (0, 0), pipeline_mode=single),
                pl.BlockSpec((1, Co), lambda n: (0, 0), pipeline_mode=single),
                pl.BlockSpec((K * Co, Co), lambda n: (0, 0), pipeline_mode=single),
                pl.BlockSpec((1, Co), lambda n: (0, 0), pipeline_mode=single),
                pl.BlockSpec((wd_rows, Co), lambda n: (0, 0), pipeline_mode=single),
                pl.BlockSpec((1, Co), lambda n: (0, 0), pipeline_mode=single),
            ],
            out_specs=pl.BlockSpec((Bt, L, Co), lambda n: (n, 0, 0)),
            scratch_shapes=[]),
        compiler_params=pltpu.CompilerParams(
            dimension_semantics=("parallel",),
            vmem_limit_bytes=vmem_limit),
        cost_estimate=cost,
    )(x_p, w1_p, b1_p, w2_p, b2_p, wd_p, bd_p)

    out = out[:N, :, :C_out]                                       # drop padding
    return jnp.transpose(out, (0, 2, 1))                           # (N, C_out, L)


def apply_weight_norm(v, g):
    # torch.nn.utils.weight_norm on Conv1d (dim=0): per-output-channel norm
    # over the (in_channels, kernel) dims.
    norm = jnp.sqrt(jnp.sum(v * v, axis=(1, 2), keepdims=True))
    return g[:, None, None] * v / norm


def reference(x, w1, b1, w2, b2, wd, bd, *, padding, dilation):
    """Pure-JAX f32 reference mirroring the PyTorch module (eval mode)."""
    def conv(z, w, b, pad, dil):
        y = lax.conv_general_dilated(
            z, w, window_strides=(1,), padding=[(pad, pad)],
            rhs_dilation=(dil,), dimension_numbers=('NCH', 'OIH', 'NCH'))
        return y + b[None, :, None]

    h = conv(x, w1, b1, padding, dilation)
    h = jax.nn.relu(h[:, :, :h.shape[2] - padding])                # Chomp1d + ReLU
    h = conv(h, w2, b2, padding, dilation)
    h = jax.nn.relu(h[:, :, :h.shape[2] - padding])
    res = conv(x, wd, bd, 0, 1)                                    # 1x1 downsample
    return jax.nn.relu(h + res)


def run_case(key, *, N, C_in, C_out, L, K, D, batch_tile=None):
    P = D * (K - 1)
    ks = jax.random.split(key, 9)
    v1 = jax.random.normal(ks[0], (C_out, C_in, K), jnp.float32) * 0.1
    g1 = 0.5 + jax.random.uniform(ks[1], (C_out,), jnp.float32)
    b1 = jax.random.normal(ks[2], (C_out,), jnp.float32) * 0.1
    v2 = jax.random.normal(ks[3], (C_out, C_out, K), jnp.float32) * 0.1
    g2 = 0.5 + jax.random.uniform(ks[4], (C_out,), jnp.float32)
    b2 = jax.random.normal(ks[5], (C_out,), jnp.float32) * 0.1
    wd = jax.random.normal(ks[6], (C_out, C_in, 1), jnp.float32) * 0.1
    bd = jax.random.normal(ks[7], (C_out,), jnp.float32) * 0.1
    x = jax.random.normal(ks[8], (N, C_in, L), jnp.float32)

    w1 = apply_weight_norm(v1, g1)
    w2 = apply_weight_norm(v2, g2)
    ref = reference(x, w1, b1, w2, b2, wd, bd, padding=P, dilation=D)

    # exact-semantics check in f32
    out_f32 = temporal_block(x, w1, b1, w2, b2, wd, bd,
                             kernel_size=K, dilation=D, batch_tile=batch_tile,
                             compute_dtype=jnp.float32, out_dtype=jnp.float32)
    out_f32 = jax.block_until_ready(out_f32)
    np.testing.assert_allclose(np.asarray(out_f32), np.asarray(ref),
                               rtol=1e-5, atol=1e-5)
    assert out_f32.shape == (N, C_out, L)

    # fast path: bf16 matmul operands + bf16 output, f32 accumulation
    out_bf16 = temporal_block(x, w1, b1, w2, b2, wd, bd,
                              kernel_size=K, dilation=D, batch_tile=batch_tile,
                              compute_dtype=jnp.bfloat16, out_dtype=jnp.bfloat16)
    out_bf16 = jax.block_until_ready(out_bf16)
    np.testing.assert_allclose(np.asarray(out_bf16.astype(jnp.float32)),
                               np.asarray(ref), rtol=5e-2, atol=5e-2)
    assert out_bf16.shape == (N, C_out, L)


if __name__ == "__main__":
    base = jax.random.PRNGKey(0)
    # Case 1: K*C_in <= 128 -> wrapper-packed conv1 taps (single 128-deep dot).
    run_case(jax.random.fold_in(base, 0),
             N=4, C_in=8, C_out=16, L=16, K=3, D=2, batch_tile=2)
    # Case 2: K*C_in > 128 -> general path (wrapper causal L-pad + in-kernel im2col).
    run_case(jax.random.fold_in(base, 1),
             N=3, C_in=48, C_out=24, L=16, K=3, D=2)
    print("KERNEL_OK")
</pallas_src>

<mosaic_0001>
module attributes {stable_mosaic.version = 11 : i64} {
  func.func @_temporal_block_kernel(%arg0: i32, %arg1: memref<2x16x128xf32, #tpu.memory_space<vmem>>, %arg2: memref<128x128xf32, #tpu.memory_space<vmem>>, %arg3: memref<1x128xf32, #tpu.memory_space<vmem>>, %arg4: memref<384x128xf32, #tpu.memory_space<vmem>>, %arg5: memref<1x128xf32, #tpu.memory_space<vmem>>, %arg6: memref<128x128xf32, #tpu.memory_space<vmem>>, %arg7: memref<1x128xf32, #tpu.memory_space<vmem>>, %arg8: memref<2x16x128xf32, #tpu.memory_space<vmem>>) attributes {dimension_semantics = [#tpu.dimension_semantics<parallel>], iteration_bounds = array<i64: 2>, scalar_prefetch = 0 : i64, scratch_operands = 0 : i64, tpu.core_type = #tpu.core_type<tc>, window_params = [{transform_indices = @transform_0, window_bounds = array<i64: 2, 16, 128>}, {pipeline_mode = #tpu.pipeline_mode<synchronous>, transform_indices = @transform_1, window_bounds = array<i64: 128, 128>}, {pipeline_mode = #tpu.pipeline_mode<synchronous>, transform_indices = @transform_2, window_bounds = array<i64: 1, 128>}, {pipeline_mode = #tpu.pipeline_mode<synchronous>, transform_indices = @transform_3, window_bounds = array<i64: 384, 128>}, {pipeline_mode = #tpu.pipeline_mode<synchronous>, transform_indices = @transform_4, window_bounds = array<i64: 1, 128>}, {pipeline_mode = #tpu.pipeline_mode<synchronous>, transform_indices = @transform_5, window_bounds = array<i64: 128, 128>}, {pipeline_mode = #tpu.pipeline_mode<synchronous>, transform_indices = @transform_6, window_bounds = array<i64: 1, 128>}, {transform_indices = @transform_7, window_bounds = array<i64: 2, 16, 128>}]} {
    %c0 = arith.constant 0 : index
    %c0_0 = arith.constant 0 : index
    %c0_1 = arith.constant 0 : index
    %0 = vector.load %arg1[%c0, %c0_0, %c0_1] : memref<2x16x128xf32, #tpu.memory_space<vmem>>, vector<2x16x128xf32>
    %1 = vector.shape_cast %0 : vector<2x16x128xf32> to vector<32x128xf32>
    %c0_2 = arith.constant 0 : index
    %c0_3 = arith.constant 0 : index
    %2 = vector.load %arg2[%c0_2, %c0_3] : memref<128x128xf32, #tpu.memory_space<vmem>>, vector<128x128xf32>
    %cst = arith.constant dense<0.000000e+00> : vector<32x128xf32>
    %3 = tpu.matmul %1, %2, %cst {dimension_numbers = #tpu.dot_dimension_numbers<[1], [0], [0], [1], [0, 0, 1, 1], [], []>} : vector<32x128xf32>, vector<128x128xf32>, vector<32x128xf32> -> vector<32x128xf32>
    %c0_4 = arith.constant 0 : index
    %c0_5 = arith.constant 0 : index
    %4 = vector.load %arg6[%c0_4, %c0_5] : memref<128x128xf32, #tpu.memory_space<vmem>>, vector<128x128xf32>
    %cst_6 = arith.constant dense<0.000000e+00> : vector<32x128xf32>
    %5 = tpu.matmul %1, %4, %cst_6 {dimension_numbers = #tpu.dot_dimension_numbers<[1], [0], [0], [1], [0, 0, 1, 1], [], []>} : vector<32x128xf32>, vector<128x128xf32>, vector<32x128xf32> -> vector<32x128xf32>
    %c0_7 = arith.constant 0 : index
    %c0_8 = arith.constant 0 : index
    %6 = vector.load %arg7[%c0_7, %c0_8] : memref<1x128xf32, #tpu.memory_space<vmem>>, vector<1x128xf32>
    %7 = vector.broadcast %6 : vector<1x128xf32> to vector<32x128xf32>
    %8 = arith.addf %5, %7 : vector<32x128xf32>
    %c0_9 = arith.constant 0 : index
    %c0_10 = arith.constant 0 : index
    %9 = vector.load %arg3[%c0_9, %c0_10] : memref<1x128xf32, #tpu.memory_space<vmem>>, vector<1x128xf32>
    %10 = vector.broadcast %9 : vector<1x128xf32> to vector<32x128xf32>
    %11 = arith.addf %3, %10 : vector<32x128xf32>
    %cst_11 = arith.constant 0.000000e+00 : f32
    %12 = vector.broadcast %cst_11 : f32 to vector<32x128xf32>
    %13 = arith.maximumf %11, %12 : vector<32x128xf32>
    %14 = vector.shape_cast %13 : vector<32x128xf32> to vector<2x16x128xf32>
    %cst_12 = arith.constant 0.000000e+00 : f32
    %15 = vector.broadcast %cst_12 : f32 to vector<2x4x128xf32>
    %16 = tpu.concatenate %15, %14 in 1 : vector<2x4x128xf32>, vector<2x16x128xf32> -> vector<2x20x128xf32>
    %17 = vector.extract_strided_slice %16 {offsets = [0, 0, 0], sizes = [2, 16, 128], strides = [1, 1, 1]} : vector<2x20x128xf32> to vector<2x16x128xf32>
    %18 = vector.extract_strided_slice %16 {offsets = [0, 2, 0], sizes = [2, 16, 128], strides = [1, 1, 1]} : vector<2x20x128xf32> to vector<2x16x128xf32>
    %19 = vector.extract_strided_slice %16 {offsets = [0, 4, 0], sizes = [2, 16, 128], strides = [1, 1, 1]} : vector<2x20x128xf32> to vector<2x16x128xf32>
    %20 = tpu.concatenate %17, %18, %19 in 2 : vector<2x16x128xf32>, vector<2x16x128xf32>, vector<2x16x128xf32> -> vector<2x16x384xf32>
    %21 = vector.shape_cast %20 : vector<2x16x384xf32> to vector<32x384xf32>
    %c0_13 = arith.constant 0 : index
    %c0_14 = arith.constant 0 : index
    %22 = vector.load %arg4[%c0_13, %c0_14] : memref<384x128xf32, #tpu.memory_space<vmem>>, vector<384x128xf32>
    %cst_15 = arith.constant dense<0.000000e+00> : vector<32x128xf32>
    %23 = tpu.matmul %21, %22, %cst_15 {dimension_numbers = #tpu.dot_dimension_numbers<[1], [0], [0], [1], [0, 0, 1, 1], [], []>} : vector<32x384xf32>, vector<384x128xf32>, vector<32x128xf32> -> vector<32x128xf32>
    %c0_16 = arith.constant 0 : index
    %c0_17 = arith.constant 0 : index
    %24 = vector.load %arg5[%c0_16, %c0_17] : memref<1x128xf32, #tpu.memory_space<vmem>>, vector<1x128xf32>
    %25 = vector.broadcast %24 : vector<1x128xf32> to vector<32x128xf32>
    %26 = arith.addf %23, %25 : vector<32x128xf32>
    %cst_18 = arith.constant 0.000000e+00 : f32
    %27 = vector.broadcast %cst_18 : f32 to vector<32x128xf32>
    %28 = arith.maximumf %26, %27 : vector<32x128xf32>
    %29 = arith.addf %28, %8 : vector<32x128xf32>
    %cst_19 = arith.constant 0.000000e+00 : f32
    %30 = vector.broadcast %cst_19 : f32 to vector<32x128xf32>
    %31 = arith.maximumf %29, %30 : vector<32x128xf32>
    %32 = vector.shape_cast %31 : vector<32x128xf32> to vector<2x16x128xf32>
    %c0_20 = arith.constant 0 : index
    %c0_21 = arith.constant 0 : index
    %c0_22 = arith.constant 0 : index
    %33 = vector.load %arg8[%c0_20, %c0_21, %c0_22] : memref<2x16x128xf32, #tpu.memory_space<vmem>>, vector<2x16x128xf32>
    tpu.vector_store %arg8[%c0_20, %c0_21, %c0_22], %32 {strides = array<i32>} : memref<2x16x128xf32, #tpu.memory_space<vmem>>, vector<2x16x128xf32>,
    return
  }
  func.func @transform_0(%arg0: i32) -> (i32, i32, i32) {
    %c0_i32 = arith.constant 0 : i32
    %c0_i32_0 = arith.constant 0 : i32
    %c0_i32_1 = arith.constant 0 : i32
    return %arg0, %c0_i32, %c0_i32_0 : i32, i32, i32
  }
  func.func @transform_1(%arg0: i32) -> (i32, i32) {
    %c0_i32 = arith.constant 0 : i32
    %c0_i32_0 = arith.constant 0 : i32
    %c0_i32_1 = arith.constant 0 : i32
    return %c0_i32, %c0_i32_0 : i32, i32
  }
  func.func @transform_2(%arg0: i32) -> (i32, i32) {
    %c0_i32 = arith.constant 0 : i32
    %c0_i32_0 = arith.constant 0 : i32
    %c0_i32_1 = arith.constant 0 : i32
    return %c0_i32, %c0_i32_0 : i32, i32
  }
  func.func @transform_3(%arg0: i32) -> (i32, i32) {
    %c0_i32 = arith.constant 0 : i32
    %c0_i32_0 = arith.constant 0 : i32
    %c0_i32_1 = arith.constant 0 : i32
    return %c0_i32, %c0_i32_0 : i32, i32
  }
  func.func @transform_4(%arg0: i32) -> (i32, i32) {
    %c0_i32 = arith.constant 0 : i32
    %c0_i32_0 = arith.constant 0 : i32
    %c0_i32_1 = arith.constant 0 : i32
    return %c0_i32, %c0_i32_0 : i32, i32
  }
  func.func @transform_5(%arg0: i32) -> (i32, i32) {
    %c0_i32 = arith.constant 0 : i32
    %c0_i32_0 = arith.constant 0 : i32
    %c0_i32_1 = arith.constant 0 : i32
    return %c0_i32, %c0_i32_0 : i32, i32
  }
  func.func @transform_6(%arg0: i32) -> (i32, i32) {
    %c0_i32 = arith.constant 0 : i32
    %c0_i32_0 = arith.constant 0 : i32
    %c0_i32_1 = arith.constant 0 : i32
    return %c0_i32, %c0_i32_0 : i32, i32
  }
  func.func @transform_7(%arg0: i32) -> (i32, i32, i32) {
    %c0_i32 = arith.constant 0 : i32
    %c0_i32_0 = arith.constant 0 : i32
    %c0_i32_1 = arith.constant 0 : i32
    return %arg0, %c0_i32, %c0_i32_0 : i32, i32, i32
  }
}

</mosaic_0001>

<bundles_post_ra>
// kernel: tpu_custom_call.1
= control target key start
LH: loop header
LB: loop body
LE: loop exit
PB: predicated region body
PF: predicated region fallthrough
CT: control target
= control target key end

     0   :  { %12 = vsyncpa [#allocation3], 0  ;;  %s1990_s0 = inlined_call_operand.hbm [shape: f32[4,16,128], index: 0, kind: input, shape index: {}]   ;;  %s1991_s1 = inlined_call_operand.hbm [shape: f32[128,128], index: 1, kind: input, shape index: {}]   ;;  %s1992_s2 = inlined_call_operand.vmem [shape: f32[1,128], index: 2, kind: input, shape index: {}]   ;;  %s1993_s3 = inlined_call_operand.hbm [shape: f32[384,128], index: 3, kind: input, shape index: {}]   ;;  %s1994_s4 = inlined_call_operand.vmem [shape: f32[1,128], index: 4, kind: input, shape index: {}]   ;;  %s1995_s5 = inlined_call_operand.hbm [shape: f32[128,128], index: 5, kind: input, shape index: {}]   ;;  %s1996_s6 = inlined_call_operand.vmem [shape: f32[1,128], index: 6, kind: input, shape index: {}]   ;;  %s1997_s7 = inlined_call_operand.hbm [shape: f32[4,16,128], index: 7, kind: output, shape index: {}]  }
   0x1   :  { %14 = vsyncpa [#allocation3 + $0x1], 0 }
   0x2   :  { %15 = vsyncpa [#allocation6], 0 }
   0x3   :  { %16 = vsyncpa [#allocation9], 0 }
   0x4   :  { %17 = vsyncpa [#allocation4], 0 }
   0x5   :  { %19 = vsyncpa [#allocation4 + $0x1], 0  ;;  %s1673_s24 = smov 0   ;;  %s1675_s25 = smov 0  }
   0x6   :  { %s1677_s26 = smov 0   ;;  %s1679_s27 = smov 0  }
   0x7 LB: > { %s1694_s28 = sadd.s32 4294967295, %s1622_s27   ;;  %s974_s29 = sadd.s32 4294967294, %s1622_s27   ;;  %s1622_s27 = sphi %s1679_s27, %s2025_s27   ;;  %s1618_s26 = sphi %s1677_s26, %s2024_s26   ;;  %s1614_s25 = sphi %s1675_s25, %s2023_s25   ;;  %s1610_s24 = sphi %s1673_s24, %s2022_s24  }
   0x8   : > { %p45_p0 = scmp.ne.s32.totalorder %s1614_s25, %s1610_s24  ;;  %p1998_p1 = scmp.eq.s32.totalorder %s1694_s28, 0 }
   0x9   : > { %p201_p3 = scmp.eq.s32.totalorder %s974_s29, 1  ;;  %p975_p5 = scmp.ge.s32.totalorder %s1622_s27, 1 }
   0xa   : > { %p1703_p4 = por %p1998_p1, %p45_p0  ;;  %p208_p7 = scmp.lt.s32.totalorder %s1622_s27, 3 }
   0xb   : > { %p1708_p6 = por %p201_p3, %p45_p0  ;;  %s1624_s10 = smov [#allocation5]  }
   0xc   : > { %s2002_s30 = scalar_select %p1703_p4, 1, 0 }
   0xd   : > { %s2003_s8 = scalar_select %p1708_p6, 1, 0 }
   0xe   : > { %p1713_p8 = pnand %p975_p5, %p208_p7  ;;  %s220_s11 = sshll.u32 %s1624_s10, 4  ;;  %s1717_s11 = int_to_ptr.vmem [resolvable:$true] %s220_s11 }
   0xf   : > { %2004 = sst [smem:[#allocation15_spill]] %s2003_s8  ;;  %s1625_s13 = smov [#allocation7]  }
  0x10   : > { %s2005_s9 = scalar_select %p1713_p8, 1, 0 }
  0x11   : > { %p1369_p9 = pneg %p1713_p8  ;;  %s236_s14 = sshll.u32 %s1625_s13, 4  ;;  %s1728_s14 = int_to_ptr.vmem [resolvable:$true] %s236_s14 }
  0x12   : > { %s1626_s15 = smov [#allocation8]   ;;  %s1434_s19 = scalar_lea.hbm %s1991_s1, 2048 }
  0x13   : > { %p1724_p11 = pnand %p1369_p9, %p1998_p1  ;;  %s1730_s16 = sshll.u32 %s1626_s15, 4  ;;  %s253_s16 = int_to_ptr.vmem [resolvable:$true] %s1730_s16 }
  0x14   : > { %p1435_p12 = scmp.ne.s32.totalorder %s1991_s1, %s1434_s19  ;;  %p1441_p5 = scmp.lt.u32.totalorder %s1434_s19, %s1991_s1 }
  0x15   : > { %p1740_p13 = pneg %p1724_p11 }
  0x17   : > { %p1437_p0 = pnand %p1740_p13, %p1435_p12 }
  0x19   : > { %p1438_p3 = pneg %p1437_p0 }
  0x1b   : > { %p1443_p7 = pnand %p1441_p5, %p1438_p3 }
  0x1d   : > { %1446 = shalt.err (!%p1443_p7)
}
  0x1e   : > { %s1447_s10 = scalar_lea.vmem %s1717_s11, 2048  ;;  %p1455_p2 = scmp.lt.s32.totalorder %s1717_s11, %s1717_s11 }
  0x1f   : > { %p1448_p9 = scmp.ne.s32.totalorder %s1717_s11, %s1447_s10  ;;  %p1456_p6 = scmp.lt.s32.totalorder %s1447_s10, %s1447_s10 }
  0x21   : > { %p1450_p10 = pnand %p1448_p9, %p1740_p13  ;;  %p1457_p12 = por %p1456_p6, %p1455_p2 }
  0x23   : > { %p1451_p1 = pneg %p1450_p10 }
  0x25   : > { %p1458_p0 = pnand %p1457_p12, %p1451_p1 }
  0x27   : > { %1461 = shalt.err (!%p1458_p0)
}
  0x28   : > { %s1627_s13 = smov 128   ;;  %s1628_s15 = smov 8  }
  0x29   : > { %1372 = dma.hbm_to_vmem [thread:$0]  (!%p1724_p11), %s1991_s1, 2048, %s1717_s11, [#allocation6], %s1627_s13, %s1627_s13, %s1628_s15  }
  0x2a   : > { %s1462_s21 = scalar_lea.hbm %s1993_s3, 6144 }
  0x2b   : > { %p1463_p1 = scmp.ne.s32.totalorder %s1993_s3, %s1462_s21  ;;  %p1469_p10 = scmp.lt.u32.totalorder %s1462_s21, %s1993_s3 }
  0x2d   : > { %p1465_p2 = pnand %p1463_p1, %p1740_p13 }
  0x2f   : > { %p1466_p6 = pneg %p1465_p2 }
  0x31   : > { %p1471_p3 = pnand %p1469_p10, %p1466_p6 }
  0x33   : > { %1474 = shalt.err (!%p1471_p3)
}
  0x34   : > { %s1475_s11 = scalar_lea.vmem %s1728_s14, 6144  ;;  %p1483_p12 = scmp.lt.s32.totalorder %s1728_s14, %s1728_s14 }
  0x35   : > { %p1476_p5 = scmp.ne.s32.totalorder %s1728_s14, %s1475_s11  ;;  %p1484_p0 = scmp.lt.s32.totalorder %s1475_s11, %s1475_s11 }
  0x37   : > { %p1478_p7 = pnand %p1476_p5, %p1740_p13  ;;  %p1485_p1 = por %p1484_p0, %p1483_p12 }
  0x39   : > { %p1479_p9 = pneg %p1478_p7 }
  0x3b   : > { %p1486_p2 = pnand %p1485_p1, %p1479_p9 }
  0x3d   : > { %1489 = shalt.err (!%p1486_p2)
}
  0x3e   : > { %1375 = dma.hbm_to_vmem [thread:$0]  (!%p1724_p11), %s1993_s3, 6144, %s1728_s14, [#allocation6], %s1627_s13, %s1627_s13, %s1628_s15  }
  0x3f   : > { %s1490_s20 = scalar_lea.hbm %s1995_s5, 2048 }
  0x40   : > { %p1491_p6 = scmp.ne.s32.totalorder %s1995_s5, %s1490_s20  ;;  %p1497_p5 = scmp.lt.u32.totalorder %s1490_s20, %s1995_s5 }
  0x42   : > { %p1493_p10 = pnand %p1491_p6, %p1740_p13 }
  0x44   : > { %p1494_p3 = pneg %p1493_p10 }
  0x46   : > { %p1499_p7 = pnand %p1497_p5, %p1494_p3 }
  0x48   : > { %1502 = shalt.err (!%p1499_p7)
}
  0x49   : > { %s1503_s11 = scalar_lea.vmem %s253_s16, 2048  ;;  %p1511_p1 = scmp.lt.s32.totalorder %s253_s16, %s253_s16 }
  0x4a   : > { %p1504_p9 = scmp.ne.s32.totalorder %s253_s16, %s1503_s11  ;;  %p1512_p2 = scmp.lt.s32.totalorder %s1503_s11, %s1503_s11 }
  0x4c   : > { %p1506_p12 = pnand %p1504_p9, %p1740_p13  ;;  %p1513_p4 = por %p1512_p2, %p1511_p1 }
  0x4e   : > { %p1507_p0 = pneg %p1506_p12 }
  0x50   : > { %p1514_p8 = pnand %p1513_p4, %p1507_p0 }
  0x52   : > { %1517 = shalt.err (!%p1514_p8)
}
  0x53   : > { %1378 = dma.hbm_to_vmem [thread:$0]  (!%p1724_p11), %s1995_s5, 2048, %s253_s16, [#allocation9], %s1627_s13, %s1627_s13, %s1628_s15  }
  0x54   : > { %s1813_s22 = sadd.s32 1, %s1622_s27   ;;  %s32_s17 = sadd.s32 1, %s1618_s26 }
  0x55   : > { %s29_s12 = ssub.s32 %s1622_s27, %s1813_s22  ;;  %p39_p8 = scmp.ne.s32.totalorder %s1618_s26, %s1614_s25 }
  0x56   : > { %p30_p4 = scmp.eq.s32.totalorder %s29_s12, 0  ;;  %p40_p13 = scmp.eq.s32.totalorder %s1622_s27, 0 }
  0x57   : > { %p1390_p6 = scmp.lt.s32.totalorder %s1622_s27, 2  ;;  %p2008_p3 = scmp.eq.s32.totalorder %s1694_s28, 1 }
  0x58   : > { %s1823_s18 = scalar_select %p30_p4, %s1618_s26, %s32_s17  }
  0x59   : > { %p41_p10 = por %p40_p13, %p39_p8  ;;  %p1827_p5 = por %p2008_p3, %p39_p8 }
  0x5a   : > { %s269_s20 = sand.u32 1, %s1618_s26   ;;  %s1004_s21 = sshll.u32 %s1622_s27, 9 }
  0x5b   : > { %s980_s16 = sshll.u32 %s269_s20, 5  ;;  %s1836_s10 = scalar_lea.hbm %s1990_s0, %s1004_s21 }
  0x5c   : > { %s273_s11 = scalar_lea.vmem [#allocation2], %s980_s16  ;;  %p1838_p11 = pnand %p1390_p6, %p41_p10 }
  0x5d   : > { %s281_s14 = sshll.u32 %s273_s11, 4  ;;  %s1844_s12 = scalar_lea.sflag [#allocation3], %s269_s20  ;;  %s1842_s14 = int_to_ptr.vmem [resolvable:$true] %s281_s14 }
  0x5e   : > { %s1518_s17 = scalar_lea.hbm %s1836_s10, 512  ;;  %p1520_p9 = pneg %p1838_p11 }
  0x5f   : > { %p1519_p7 = scmp.ne.s32.totalorder %s1836_s10, %s1518_s17  ;;  %s1523_s23 = scalar_lea.hbm %s1990_s0, 1024 }
  0x60   : > { %p1524_p1 = scmp.lt.u32.totalorder %s1836_s10, %s1990_s0  ;;  %p1525_p2 = scmp.lt.u32.totalorder %s1523_s23, %s1518_s17 }
  0x61   : > { %p1521_p12 = pnand %p1520_p9, %p1519_p7  ;;  %p1527_p8 = scmp.lt.u32.totalorder %s1518_s17, %s1836_s10 }
  0x62   : > { %p1526_p4 = por %p1525_p2, %p1524_p1 }
  0x63   : > { %p1522_p0 = pneg %p1521_p12 }
  0x64   : > { %p1528_p13 = por %p1527_p8, %p1526_p4 }
  0x66   : > { %p1529_p6 = pnand %p1528_p13, %p1522_p0 }
  0x68   : > { %1532 = shalt.err (!%p1529_p6)
}
  0x69   : > { %s1533_s20 = scalar_lea.vmem %s1842_s14, 512  ;;  %s1629_s21 = smov [#allocation2]  }
  0x6a   : > { %p1534_p10 = scmp.ne.s32.totalorder %s1842_s14, %s1533_s20  ;;  %s1538_s16 = sshll.u32 %s1629_s21, 4  ;;  %s1539_s16 = int_to_ptr.vmem [resolvable:$false] %s1538_s16 }
  0x6b   : > { %s1540_s29 = scalar_lea.vmem %s1539_s16, 1024  ;;  %p1541_p12 = scmp.lt.s32.totalorder %s1842_s14, %s1539_s16 }
  0x6c   : > { %p1536_p3 = pnand %p1534_p10, %p1520_p9  ;;  %p1542_p1 = scmp.lt.s32.totalorder %s1540_s29, %s1533_s20 }
  0x6e   : > { %p1537_p7 = pneg %p1536_p3  ;;  %p1543_p2 = por %p1542_p1, %p1541_p12 }
  0x70   : > { %p1544_p4 = pnand %p1543_p2, %p1537_p7 }
  0x72   : > { %1547 = shalt.err (!%p1544_p4)
}
  0x73   : > { %1382 = dma.hbm_to_vmem [thread:$0]  (!%p1838_p11), %s1836_s10, 512, %s1842_s14, %s1844_s12, %s1627_s13, %s1627_s13, %s1628_s15  }
  0x74   : > { %p2011_p9 = scmp.ne.s32.totalorder %s2005_s9, 0 }
  0x75   : > { %s1878_s17 = sand.u32 (!%p2011_p9), 1, %s1614_s25   ;;  %p2012_p0 = scmp.ne.s32.totalorder (!%p2011_p9), %s2002_s30, 0 }
  0x76   : > { %293 = sbr.rel (%p2011_p9) target bundleno = 644 (0x284), region = 48  ;;  %s985_s23 = sshll.u32 (!%p2011_p9), %s1878_s17, 5 }
  0x77   : > { %s296_s11 = scalar_lea.sflag (!%p2011_p9), [#allocation3], %s1878_s17  ;;  %s1884_s8 = scalar_lea.vmem (!%p2011_p9), [#allocation2], %s985_s23 }
  0x7d   : > { %1593 = dma.done.wait (%p2012_p0), %s296_s11, 512  }
  0x7e   : > { %1595 = vsyncadd (%p2012_p0), %s296_s11, 4294966784  ;;  %p2013_p11 = scmp.eq.s32.totalorder %s1694_s28, 0 }
  0x80   : > { %1597 = dma.done.wait (%p2013_p11), [#allocation6], 8192   ;;  %p2014_p8 = pmov %p2013_p11 }
  0x82   : > { %1599 = vsyncadd (%p2014_p8), [#allocation6], 4294959104  ;;  %p2015_p13 = pmov %p2014_p8 }
  0x83   : > { %p2016_p6 = pmov %p2014_p8 }
  0x84   : > { %1601 = dma.done.wait (%p2015_p13), [#allocation9], 2048  }
  0x85   : > { %1603 = vsyncadd (%p2016_p6), [#allocation9], 4294965248  ;;  %v348_v0 = vld [vmem:[#allocation5] sm:$0xff]  ;;  %v349_v1 = vld [vmem:[#allocation5 + $0x8] sm:$0xff]  ;;  %vm572_vm0 = vcmask 1043456   ;;  %vm587_vm1 = vcmask 1045504  }
  0x86   : > { %v350_v2 = vld [vmem:[#allocation5 + $0x10] sm:$0xff]  ;;  %v1257_v3 = vpack.c.bf16 %v349_v1, %v348_v0  ;;  %v351_v4 = vld [vmem:[#allocation5 + $0x18] sm:$0xff]  ;;  %v352_v6 = vld [vmem:[#allocation5 + $0x20] sm:$0xff]  ;;  %s341_s12 = scalar_lea.vmem [#allocation10], %s985_s23  ;;  %s1006_s21 = sshll.u32 %s1694_s28, 9 }
  0x87   : > { %v1261_v5 = vpack.c.bf16 %v351_v4, %v350_v2  ;;  %v353_v7 = vld [vmem:[#allocation5 + $0x28] sm:$0xff]  ;;  %v344_v9 = vld [vmem:[%s1884_s8] sm:$0xff]  ;;  %v354_v10 = vld [vmem:[#allocation5 + $0x30] sm:$0xff]  ;;  %s872_s20 = sshll.u32 %s341_s12, 4  ;;  %s1946_s23 = scalar_lea.hbm %s1997_s7, %s1006_s21  ;;  %s1941_s20 = int_to_ptr.vmem [resolvable:$true] %s872_s20 }
  0x88   : > { %1258 = vmatprep.subr.bf16.mxu1 %v1257_v3  ;;  %v1265_v8 = vpack.c.bf16 %v353_v7, %v352_v6  ;;  %v355_v11 = vld [vmem:[#allocation5 + $0x38] sm:$0xff]  ;;  %1181 = vmatprep.mubr.f32.mxu1 %v344_v9  ;;  %v364_v12 = vld [vmem:[#allocation8] sm:$0xff]  ;;  %v365_v13 = vld [vmem:[#allocation8 + $0x8] sm:$0xff]  ;;  %s858_s11 = scalar_lea.sflag [#allocation4], %s1878_s17  ;;  %s1630_s28 = smov [#allocation10]  }
  0x89   : > { %1260 = vmatpush3.bf16.msra.mxu1 %v1257_v3  ;;  %1143 = vmatprep.mubr.f32.mxu0 %v344_v9  ;;  %v366_v14 = vld [vmem:[#allocation8 + $0x10] sm:$0xff]  ;;  %v367_v15 = vld [vmem:[#allocation8 + $0x18] sm:$0xff]  ;;  %v1225_v16 = vpack.c.bf16 %v365_v13, %v364_v12  ;;  %v1269_v18 = vpack.c.bf16 %v355_v11, %v354_v10  ;;  %v368_v19 = vld [vmem:[#allocation8 + $0x20] sm:$0xff]  ;;  %s1552_s30 = sshll.u32 %s1630_s28, 4  ;;  %s1553_s30 = int_to_ptr.vmem [resolvable:$false] %s1552_s30 }
  0x8a   : > { %1262 = vmatprep.subr.bf16.mxu1 %v1261_v5  ;;  %v1229_v17 = vpack.c.bf16 %v367_v15, %v366_v14  ;;  %v369_v20 = vld [vmem:[#allocation8 + $0x28] sm:$0xff]  ;;  %v356_v21 = vld [vmem:[#allocation5 + $0x40] sm:$0xff]  ;;  %v370_v25 = vld [vmem:[#allocation8 + $0x30] sm:$0xff]  ;;  %s1554_s9 = scalar_lea.vmem %s1553_s30, 1024  ;;  %p1555_p12 = scmp.lt.s32.totalorder %s1941_s20, %s1553_s30 }
  0x8b   : > { %v357_v22 = vld [vmem:[#allocation5 + $0x48] sm:$0xff]  ;;  %1226 = vmatprep.subr.bf16.mxu0 %v1225_v16  ;;  %v1233_v23 = vpack.c.bf16 %v369_v20, %v368_v19  ;;  %v371_v26 = vld [vmem:[#allocation8 + $0x38] sm:$0xff]  ;;  %v358_v27 = vld [vmem:[#allocation5 + $0x50] sm:$0xff] }
  0x8c   : > { %1228 = vmatpush3.bf16.msra.mxu0 %v1225_v16  ;;  %v1273_v24 = vpack.c.bf16 %v357_v22, %v356_v21  ;;  %v359_v28 = vld [vmem:[#allocation5 + $0x58] sm:$0xff]  ;;  %v1237_v29 = vpack.c.bf16 %v371_v26, %v370_v25  ;;  %v372_v31 = vld [vmem:[#allocation8 + $0x40] sm:$0xff]  ;;  %v373_v32 = vld [vmem:[#allocation8 + $0x48] sm:$0xff] }
  0x8d   : > { %1264 = vmatpush3.bf16.msra.mxu1 %v1261_v5  ;;  %1230 = vmatprep.subr.bf16.mxu0 %v1229_v17  ;;  %v1277_v30 = vpack.c.bf16 %v359_v28, %v358_v27  ;;  %v360_v33 = vld [vmem:[#allocation5 + $0x60] sm:$0xff]  ;;  %v361_v34 = vld [vmem:[#allocation5 + $0x68] sm:$0xff]  ;;  %v1241_v35 = vpack.c.bf16 %v373_v32, %v372_v31  ;;  %v374_v37 = vld [vmem:[#allocation8 + $0x50] sm:$0xff] }
  0x8e   : > { %1266 = vmatprep.subr.bf16.mxu1 %v1265_v8  ;;  %v1281_v36 = vpack.c.bf16 %v361_v34, %v360_v33  ;;  %v375_v38 = vld [vmem:[#allocation8 + $0x58] sm:$0xff]  ;;  %v362_v39 = vld [vmem:[#allocation5 + $0x70] sm:$0xff]  ;;  %v376_v43 = vld [vmem:[#allocation8 + $0x60] sm:$0xff] }
  0x8f   : > { %v363_v40 = vld [vmem:[#allocation5 + $0x78] sm:$0xff]  ;;  %v1245_v41 = vpack.c.bf16 %v375_v38, %v374_v37  ;;  %v377_v44 = vld [vmem:[#allocation8 + $0x68] sm:$0xff]  ;;  %v648_v45 = vld [vmem:[#allocation7 + $0x100] sm:$0xff] }
  0x90   : > { %1232 = vmatpush3.bf16.msra.mxu0 %v1229_v17  ;;  %v1285_v42 = vpack.c.bf16 %v363_v40, %v362_v39  ;;  %v649_v46 = vld [vmem:[#allocation7 + $0x108] sm:$0xff]  ;;  %v1249_v47 = vpack.c.bf16 %v377_v44, %v376_v43  ;;  %v378_v48 = vld [vmem:[#allocation8 + $0x70] sm:$0xff]  ;;  %v379_v49 = vld [vmem:[#allocation8 + $0x78] sm:$0xff] }
  0x91   : > { %1268 = vmatpush3.bf16.msra.mxu1 %v1265_v8  ;;  %1234 = vmatprep.subr.bf16.mxu0 %v1233_v23  ;;  %v1321_v50 = vpack.c.bf16 %v649_v46, %v648_v45  ;;  %v650_v51 = vld [vmem:[#allocation7 + $0x110] sm:$0xff]  ;;  %v651_v52 = vld [vmem:[#allocation7 + $0x118] sm:$0xff]  ;;  %v345_v53 = vld [vmem:[%s1884_s8 + $0x8] sm:$0xff]  ;;  %v1253_v54 = vpack.c.bf16 %v379_v49, %v378_v48 }
  0x92   : > { %1270 = vmatprep.subr.bf16.mxu1 %v1269_v18  ;;  %v346_v55 = vld [vmem:[%s1884_s8 + $0x10] sm:$0xff]  ;;  %v632_v56 = vld [vmem:[#allocation7 + $0x80] sm:$0xff]  ;;  %v633_v57 = vld [vmem:[#allocation7 + $0x88] sm:$0xff]  ;;  %v1325_v58 = vpack.c.bf16 %v651_v52, %v650_v51 }
  0x93   : > { %v652_v59 = vld [vmem:[#allocation7 + $0x120] sm:$0xff]  ;;  %v653_v60 = vld [vmem:[#allocation7 + $0x128] sm:$0xff]  ;;  %v347_v61 = vld [vmem:[%s1884_s8 + $0x18] sm:$0xff]  ;;  %v1289_v62 = vpack.c.bf16 %v633_v57, %v632_v56  ;;  %s1548_s8 = scalar_lea.vmem %s1941_s20, 512 }
  0x94   : > { %1236 = vmatpush3.bf16.msra.mxu0 %v1233_v23  ;;  %v616_v63 = vld [vmem:[#allocation7] sm:$0xff]  ;;  %v617_v0 = vld [vmem:[#allocation7 + $0x8] sm:$0xff]  ;;  %v634_v1 = vld [vmem:[#allocation7 + $0x90] sm:$0xff]  ;;  %v1329_v3 = vpack.c.bf16 %v653_v60, %v652_v59  ;;  %p1549_p10 = scmp.ne.s32.totalorder %s1941_s20, %s1548_s8  ;;  %p1556_p1 = scmp.lt.s32.totalorder %s1554_s9, %s1548_s8 }
  0x95   : > { %1272 = vmatpush3.bf16.msra.mxu1 %v1269_v18  ;;  %1238 = vmatprep.subr.bf16.mxu0 %v1237_v29  ;;  %v635_v2 = vld [vmem:[#allocation7 + $0x98] sm:$0xff]  ;;  %v1291_v4 = vpack.c.bf16 %v617_v0, %v616_v63  ;;  %v654_v5 = vld [vmem:[#allocation7 + $0x130] sm:$0xff]  ;;  %v636_v10 = vld [vmem:[#allocation7 + $0xa0] sm:$0xff] }
  0x96   : > { %1274 = vmatprep.subr.bf16.mxu1 %v1273_v24  ;;  %v655_v6 = vld [vmem:[#allocation7 + $0x138] sm:$0xff]  ;;  %v1293_v7 = vpack.c.bf16 %v635_v2, %v634_v1  ;;  %v618_v8 = vld [vmem:[#allocation7 + $0x10] sm:$0xff]  ;;  %v637_v11 = vld [vmem:[#allocation7 + $0xa8] sm:$0xff]  ;;  %p1550_p3 = pnand %p1549_p10, %p1827_p5  ;;  %p1557_p2 = por %p1556_p1, %p1555_p12 }
  0x97   : > { %v619_v9 = vld [vmem:[#allocation7 + $0x18] sm:$0xff]  ;;  %v1333_v12 = vpack.c.bf16 %v655_v6, %v654_v5  ;;  %v656_v14 = vld [vmem:[#allocation7 + $0x140] sm:$0xff]  ;;  %v657_v15 = vld [vmem:[#allocation7 + $0x148] sm:$0xff]  ;;  %v1297_v16 = vpack.c.bf16 %v637_v11, %v636_v10 }
  0x98   : > { %1240 = vmatpush3.bf16.msra.mxu0 %v1237_v29  ;;  %v1295_v13 = vpack.c.bf16 %v619_v9, %v618_v8  ;;  %v620_v17 = vld [vmem:[#allocation7 + $0x20] sm:$0xff]  ;;  %v621_v18 = vld [vmem:[#allocation7 + $0x28] sm:$0xff]  ;;  %v638_v19 = vld [vmem:[#allocation7 + $0xb0] sm:$0xff]  ;;  %v1337_v21 = vpack.c.bf16 %v657_v15, %v656_v14  ;;  %p1551_p7 = pneg %p1550_p3 }
  0x99   : > { %1276 = vmatpush3.bf16.msra.mxu1 %v1273_v24  ;;  %1242 = vmatprep.subr.bf16.mxu0 %v1241_v35  ;;  %v639_v20 = vld [vmem:[#allocation7 + $0xb8] sm:$0xff]  ;;  %v1299_v22 = vpack.c.bf16 %v621_v18, %v620_v17  ;;  %v622_v24 = vld [vmem:[#allocation7 + $0x30] sm:$0xff]  ;;  %v640_v26 = vld [vmem:[#allocation7 + $0xc0] sm:$0xff] }
  0x9a   : > { %1278 = vmatprep.subr.bf16.mxu1 %v1277_v30  ;;  %v1301_v23 = vpack.c.bf16 %v639_v20, %v638_v19  ;;  %v623_v25 = vld [vmem:[#allocation7 + $0x38] sm:$0xff]  ;;  %v641_v27 = vld [vmem:[#allocation7 + $0xc8] sm:$0xff]  ;;  %v642_v33 = vld [vmem:[#allocation7 + $0xd0] sm:$0xff]  ;;  %p1558_p4 = pnand %p1557_p2, %p1551_p7 }
  0x9b   : > { %v1303_v28 = vpack.c.bf16 %v623_v25, %v622_v24  ;;  %v1305_v29 = vpack.c.bf16 %v641_v27, %v640_v26  ;;  %v625_v31 = vld [vmem:[#allocation7 + $0x48] sm:$0xff]  ;;  %v643_v34 = vld [vmem:[#allocation7 + $0xd8] sm:$0xff]  ;;  %v626_v38 = vld [vmem:[#allocation7 + $0x50] sm:$0xff] }
  0x9c   : > { %1244 = vmatpush3.bf16.msra.mxu0 %v1241_v35  ;;  %v658_v35 = vld [vmem:[#allocation7 + $0x150] sm:$0xff]  ;;  %v659_v37 = vld [vmem:[#allocation7 + $0x158] sm:$0xff]  ;;  %v645_v43 = vld [vmem:[#allocation7 + $0xe8] sm:$0xff] }
  0x9d   : > { %1280 = vmatpush3.bf16.msra.mxu1 %v1277_v30  ;;  %1246 = vmatprep.subr.bf16.mxu0 %v1245_v41  ;;  %v624_v30 = vld [vmem:[#allocation7 + $0x40] sm:$0xff]  ;;  %v627_v39 = vld [vmem:[#allocation7 + $0x58] sm:$0xff]  ;;  %v1341_v40 = vpack.c.bf16 %v659_v37, %v658_v35  ;;  %v661_v46 = vld [vmem:[#allocation7 + $0x168] sm:$0xff] }
  0x9e   : > { %1282 = vmatprep.subr.bf16.mxu1 %v1281_v36  ;;  %v1307_v32 = vpack.c.bf16 %v625_v31, %v624_v30  ;;  %v660_v44 = vld [vmem:[#allocation7 + $0x160] sm:$0xff]  ;;  %v629_v48 = vld [vmem:[#allocation7 + $0x68] sm:$0xff]  ;;  %v646_v51 = vld [vmem:[#allocation7 + $0xf0] sm:$0xff] }
  0x9f   : > { %v1345_v49 = vpack.c.bf16 %v661_v46, %v660_v44  ;;  %v647_v52 = vld [vmem:[#allocation7 + $0xf8] sm:$0xff]  ;;  %v630_v56 = vld [vmem:[#allocation7 + $0x70] sm:$0xff]  ;;  %v991_v60 = vld [vmem:[%s1992_s2] ss:$0 sm:$0xff] }
  0xa0   : > { %1248 = vmatpush3.bf16.msra.mxu0 %v1245_v41  ;;  %v1311_v41 = vpack.c.bf16 %v627_v39, %v626_v38  ;;  %v631_v57 = vld [vmem:[#allocation7 + $0x78] sm:$0xff]  ;;  %vm1910_vm2 = vmneg %vm572_vm0 }
  0xa1   : > { %1284 = vmatpush3.bf16.msra.mxu1 %v1281_v36  ;;  %1250 = vmatprep.subr.bf16.mxu0 %v1249_v47  ;;  %v1309_v36 = vpack.c.bf16 %v643_v34, %v642_v33  ;;  %v1319_v59 = vpack.c.bf16 %v631_v57, %v630_v56 }
  0xa2   : > { %1286 = vmatprep.subr.bf16.mxu1 %v1285_v42 }
  0xa4   : > { %1252 = vmatpush3.bf16.msra.mxu0 %v1249_v47  ;;  %v628_v47 = vld [vmem:[#allocation7 + $0x60] sm:$0xff] }
  0xa5   : > { %1288 = vmatpush3.bf16.msra.mxu1 %v1285_v42  ;;  %1254 = vmatprep.subr.bf16.mxu0 %v1253_v54  ;;  %v644_v42 = vld [vmem:[#allocation7 + $0xe0] sm:$0xff] }
  0xa6   : > { %1322 = vmatprep.subr.bf16.mxu1 %v1321_v50  ;;  %v1313_v45 = vpack.c.bf16 %v645_v43, %v644_v42 }
  0xa8   : > { %1182 = vmatmul.mubr.f32.vlgmr.msra.gmra.mrb[0].mxu1 %v345_v53  ;;  %1256 = vmatpush3.bf16.msra.mxu0 %v1253_v54  ;;  %v1317_v54 = vpack.c.bf16 %v647_v52, %v646_v51 }
  0xa9   : > { %1184 = vmatprep.mubr.f32.mxu1 %v346_v55  ;;  %1324 = vmatpush3.bf16.msra.mxu1 %v1321_v50  ;;  %v1315_v50 = vpack.c.bf16 %v629_v48, %v628_v47 }
  0xaa   : > { %1326 = vmatprep.subr.bf16.mxu1 %v1325_v58  ;;  %1290 = vmatprep.subr.bf16.mxu0 %v1289_v62 }
  0xab   : > { %1144 = vmatmul.mubr.f32.vlgmr.msra.gmra.mrb[0].mxu0 %v345_v53  ;;  %v662_v53 = vld [vmem:[#allocation7 + $0x170] sm:$0xff] }
  0xac   : > { %1185 = vmatmul.mubr.f32.gmra.mrb[2].mxu1 %v347_v61  ;;  %1292 = vmatpush3.bf16.msra.mxu0 %v1291_v4 }
  0xad   : > { %1328 = vmatpush3.bf16.msra.mxu1 %v1325_v58  ;;  %1146 = vmatprep.mubr.f32.mxu0 %v346_v55  ;;  %v663_v55 = vld [vmem:[#allocation7 + $0x178] sm:$0xff] }
  0xae   : > { %1330 = vmatprep.subr.bf16.mxu1 %v1329_v3  ;;  %1294 = vmatprep.subr.bf16.mxu0 %v1293_v7  ;;  %v1349_v58 = vpack.c.bf16 %v663_v55, %v662_v53 }
  0xaf   : > { %1147 = vmatmul.mubr.f32.gmra.mrb[2].mxu0 %v347_v61 }
  0xb0   : > { %1296 = vmatpush3.bf16.msra.mxu0 %v1295_v13 }
  0xb1   : > { %1332 = vmatpush3.bf16.msra.mxu1 %v1329_v3  ;;  %1298 = vmatprep.subr.bf16.mxu0 %v1297_v16 }
  0xb2   : > { %1334 = vmatprep.subr.bf16.mxu1 %v1333_v12 }
  0xb4   : > { %1300 = vmatpush3.bf16.msra.mxu0 %v1299_v22 }
  0xb5   : > { %1336 = vmatpush3.bf16.msra.mxu1 %v1333_v12  ;;  %1302 = vmatprep.subr.bf16.mxu0 %v1301_v23 }
  0xb6   : > { %1338 = vmatprep.subr.bf16.mxu1 %v1337_v21 }
  0xb8   : > { %1304 = vmatpush3.bf16.msra.mxu0 %v1303_v28 }
  0xb9   : > { %1340 = vmatpush3.bf16.msra.mxu1 %v1337_v21  ;;  %1306 = vmatprep.subr.bf16.mxu0 %v1305_v29 }
  0xba   : > { %1342 = vmatprep.subr.bf16.mxu1 %v1341_v40 }
  0xbc   : > { %1308 = vmatpush3.bf16.msra.mxu0 %v1307_v32 }
  0xbd   : > { %1310 = vmatprep.subr.bf16.mxu0 %v1309_v36  ;;  %1344 = vmatpush3.bf16.msra.mxu1 %v1341_v40 }
  0xbe   : > { %1346 = vmatprep.subr.bf16.mxu1 %v1345_v49 }
  0xc0   : > { %1312 = vmatpush3.bf16.msra.mxu0 %v1311_v41 }
  0xc1   : > { %1314 = vmatprep.subr.bf16.mxu0 %v1313_v45  ;;  %1348 = vmatpush3.bf16.msra.mxu1 %v1345_v49  ;;  %v992_v45 = vld [vmem:[%s1994_s4] ss:$0 sm:$0xff] }
  0xc2   : > { %1350 = vmatprep.subr.bf16.mxu1 %v1349_v58 }
  0xc4   : > { %1316 = vmatpush3.bf16.msra.mxu0 %v1315_v50  ;;  %v990_v50 = vld [vmem:[%s1996_s6] ss:$0 sm:$0xff] }
  0xc5   : > { %1318 = vmatprep.subr.bf16.mxu0 %v1317_v54  ;;  %1352 = vmatpush3.bf16.msra.mxu1 %v1349_v58 }
  0xc8   : > { %1320 = vmatpush3.bf16.msra.mxu0 %v1319_v59 }
 0x17b   : > { %v1183_v61 = vpop.f32.mrb[0].mxu1 }
 0x17c   : > { %v551_v62 = vadd.f32 %v1183_v61, %v991_v60  ;;  %v545_v63 = vpop.f32.mrb[1].mxu1 }
 0x17d   : > { %v546_v0 = vadd.f32 %v991_v60, %v545_v63 }
 0x17e   : > { %v565_v1 = vmax.f32 %v551_v62, 0.0  ;;  %v1905_v10 = vpop.f32.mrb[0].mxu0 }
 0x17f   : > { %v564_v2 = vmax.f32 %v546_v0, 0.0  ;;  %v1186_v3 = vpop.f32.mrb[2].mxu1  ;;  %v453_v15 = vpop.f32.mrb[1].mxu0  ;;  %v459_v0 = vadd.f32 %v1905_v10, %v990_v50 }
 0x180   : > { %v574_v4 = vrot.slane %v565_v1, 4  ;;  %v561_v5 = vadd.f32 %v1186_v3, %v991_v60  ;;  %v555_v6 = vpop.f32.mrb[3].mxu1  ;;  %v454_v56 = vadd.f32 %v990_v50, %v453_v15 }
 0x181   : > { %v573_v7 = vrot.slane %v564_v2, 4  ;;  %v556_v8 = vadd.f32 %v991_v60, %v555_v6 }
 0x182   : > { %v567_v9 = vmax.f32 %v561_v5, 0.0  ;;  %v591_v11 = vrot.slane %v574_v4, 2  ;;  %v605_v20 = vrot.slane %v574_v4, 4  ;;  %v1916_v28 = vpop.f32.mrb[2].mxu0 }
 0x183   : > { %v575_v12 = vsel %vm572_vm0, %v573_v7, %v574_v4  ;;  %v583_v13 = vsel %vm572_vm0, 0.0, %v573_v7  ;;  %v566_v14 = vmax.f32 %v556_v8, 0.0  ;;  %v463_v33 = vpop.f32.mrb[3].mxu0  ;;  %v469_v15 = vadd.f32 %v1916_v28, %v990_v50 }
 0x184   : > { %v577_v16 = vrot.slane %v567_v9, 4  ;;  %v588_v17 = vrot.slane %v583_v13, 2  ;;  %v589_v18 = vrot.slane %v575_v12, 2  ;;  %v602_v19 = vrot.slane %v583_v13, 4 }
 0x185   : > { %v576_v21 = vrot.slane %v566_v14, 4  ;;  %v603_v22 = vrot.slane %v575_v12, 4  ;;  %v464_v9 = vadd.f32 %v990_v50, %v463_v33 }
 0x186   : > { %v596_v24 = vrot.slane %v577_v16, 2  ;;  %v610_v25 = vrot.slane %v577_v16, 4  ;;  %v590_v26 = vsel %vm587_vm1, %v588_v17, %v589_v18  ;;  %v592_v27 = vsel %vm587_vm1, %v589_v18, %v591_v11 }
 0x187   : > { %v578_v29 = vsel %vm572_vm0, %v576_v21, %v577_v16  ;;  %v584_v30 = vsel %vm572_vm0, 0.0, %v576_v21  ;;  %735 = vmatprep.mubr.f32.mxu0 %v590_v26  ;;  %v604_v31 = vsel %vm572_vm0, %v602_v19, %v603_v22  ;;  %v606_v32 = vsel %vm572_vm0, %v603_v22, %v605_v20 }
 0x188   : > { %1219 = vmatprep.mubr.f32.mxu1 %v604_v31  ;;  %994 = vmatmul.mubr.msk.f32.vlgmr.msra.gmra.mrb[4].mxu0 %vm1910_vm2, %v573_v7  ;;  %v607_v34 = vrot.slane %v584_v30, 4  ;;  %v608_v35 = vrot.slane %v578_v29, 4  ;;  %v593_v36 = vrot.slane %v584_v30, 2  ;;  %v594_v37 = vrot.slane %v578_v29, 2 }
 0x189   : > { %1220 = vmatmul.mubr.f32.vlgmr.msra.gmra.mrb[4].mxu1 %v606_v32  ;;  %740 = vmatprep.mubr.f32.mxu0 %v592_v27 }
 0x18a   : > { %v609_v38 = vsel %vm572_vm0, %v607_v34, %v608_v35  ;;  %v611_v39 = vsel %vm572_vm0, %v608_v35, %v610_v25  ;;  %v595_v40 = vsel %vm587_vm1, %v593_v36, %v594_v37  ;;  %v597_v41 = vsel %vm587_vm1, %v594_v37, %v596_v24 }
 0x18b   : > { %1222 = vmatprep.mubr.f32.mxu1 %v609_v38 }
 0x18c   : > { %741 = vmatmul.mubr.f32.gmra.mrb[6].mxu0 %v575_v12 }
 0x18d   : > { %1223 = vmatmul.mubr.f32.gmra.mrb[6].mxu1 %v611_v39  ;;  %745 = vmatprep.mubr.f32.mxu0 %v595_v40 }
 0x190   : > { %996 = vmatmul.mubr.msk.f32.gmra.mrb[8].mxu0 %vm1910_vm2, %v576_v21 }
 0x191   : > { %750 = vmatprep.mubr.f32.mxu0 %v597_v41 }
 0x194   : > { %751 = vmatmul.mubr.f32.gmra.mrb[10].mxu0 %v578_v29 }
 0x25b   : > { %v1079_v42 = vpop.f32.mrb[4].mxu0 }
 0x25c   : > { %v1221_v43 = vpop.f32.mrb[4].mxu1  ;;  %v1080_v44 = vpop.f32.mrb[5].mxu0 }
 0x25d   : > { %v1081_v46 = vadd.f32 %v1080_v44, %v1079_v42  ;;  %v822_v47 = vpop.f32.mrb[5].mxu1 }
 0x25f   : > { %v738_v48 = vadd.f32 %v1081_v46, %v992_v45  ;;  %v1082_v49 = vpop.f32.mrb[6].mxu0 }
 0x260   : > { %v1224_v51 = vpop.f32.mrb[6].mxu1  ;;  %v1083_v52 = vpop.f32.mrb[7].mxu0 }
 0x261   : > { %v823_v53 = vadd.f32 %v822_v47, %v738_v48  ;;  %v1084_v54 = vadd.f32 %v1083_v52, %v1082_v49  ;;  %v832_v55 = vpop.f32.mrb[7].mxu1 }
 0x263   : > { %v841_v57 = vmax.f32 %v823_v53, 0.0  ;;  %v743_v58 = vadd.f32 %v1084_v54, %v992_v45  ;;  %v1085_v59 = vpop.f32.mrb[8].mxu0 }
 0x264   : > { %v1086_v60 = vpop.f32.mrb[9].mxu0 }
 0x265   : > { %v845_v61 = vadd.f32 %v841_v57, %v454_v56  ;;  %v828_v62 = vadd.f32 %v1221_v43, %v743_v58  ;;  %v1087_v63 = vadd.f32 %v1086_v60, %v1085_v59 }
 0x267   : > { %v849_v1 = vmax.f32 %v845_v61, 0.0  ;;  %v842_v2 = vmax.f32 %v828_v62, 0.0  ;;  %v748_v3 = vadd.f32 %v1087_v63, %v992_v45  ;;  %v1088_v4 = vpop.f32.mrb[10].mxu0 }
 0x268   : > { %v1089_v5 = vpop.f32.mrb[11].mxu0 }
 0x269   : > { %853 = vst [vmem:[%s341_s12] sm:$0xff] %v849_v1  ;;  %v846_v6 = vadd.f32 %v842_v2, %v459_v0  ;;  %v833_v7 = vadd.f32 %v832_v55, %v748_v3  ;;  %v1090_v8 = vadd.f32 %v1089_v5, %v1088_v4 }
 0x26b   : > { %v850_v11 = vmax.f32 %v846_v6, 0.0  ;;  %v843_v12 = vmax.f32 %v833_v7, 0.0  ;;  %v753_v13 = vadd.f32 %v1090_v8, %v992_v45 }
 0x26d   : > { %854 = vst [vmem:[%s341_s12 + $0x8] sm:$0xff] %v850_v11  ;;  %v847_v14 = vadd.f32 %v843_v12, %v464_v9  ;;  %v838_v10 = vadd.f32 %v1224_v51, %v753_v13 }
 0x26f   : > { %v851_v16 = vmax.f32 %v847_v14, 0.0  ;;  %v844_v17 = vmax.f32 %v838_v10, 0.0 }
 0x271   : > { %855 = vst [vmem:[%s341_s12 + $0x10] sm:$0xff] %v851_v16  ;;  %v848_v18 = vadd.f32 %v844_v17, %v469_v15 }
 0x273   : > { %v852_v19 = vmax.f32 %v848_v18, 0.0 }
 0x275   : > { %856 = vst [vmem:[%s341_s12 + $0x18] sm:$0xff] %v852_v19 }
 0x276   : > { %1561 = shalt.err (!%p1558_p4)
}
 0x277   : > { %s1562_s13 = scalar_lea.hbm %s1946_s23, 512  ;;  %s1566_s14 = scalar_lea.hbm %s1997_s7, 1024 }
 0x278   : > { %p1563_p9 = scmp.ne.s32.totalorder %s1946_s23, %s1562_s13  ;;  %p1567_p8 = scmp.lt.u32.totalorder %s1946_s23, %s1997_s7 }
 0x279   : > { %p1568_p13 = scmp.lt.u32.totalorder %s1566_s14, %s1562_s13  ;;  %p1570_p10 = scmp.lt.u32.totalorder %s1562_s13, %s1946_s23 }
 0x27a   : > { %p1564_p0 = pnand %p1563_p9, %p1827_p5 }
 0x27b   : > { %p1569_p6 = por %p1568_p13, %p1567_p8 }
 0x27c   : > { %p1565_p11 = pneg %p1564_p0 }
 0x27d   : > { %p1571_p3 = por %p1570_p10, %p1569_p6 }
 0x27f   : > { %p1572_p7 = pnand %p1571_p3, %p1565_p11 }
 0x281   : > { %1575 = shalt.err (!%p1572_p7)
}
 0x282   : > { %s1631_s16 = smov 128   ;;  %s1632_s29 = smov 8  }
 0x283   : > { %1367 = dma.vmem_to_hbm [thread:$0]  (%p1827_p5), %s1941_s20, 512, %s1946_s23, %s858_s11, %s1631_s16, %s1631_s16, %s1632_s29  }
 0x284 PF: > { %s2019_s8 = sld [smem:[#allocation15_spill]]  ;;  %s887_s28 = sand.u32 1, %s1610_s24  }
 0x285   : > { %p2021_p1 = scmp.ge.s32.totalorder %s1622_s27, 2  ;;  %s888_s30 = scalar_lea.sflag [#allocation4], %s887_s28 }
 0x28a   : > { %p2020_p12 = scmp.ne.s32.totalorder %s2019_s8, 0 }
 0x28c   : > { %p1384_p2 = pnand %p2021_p1, %p2020_p12 }
 0x28e   : > { %1605 = dma.done.wait (!%p1384_p2), %s888_s30, 512  }
 0x28f   : > { %1607 = vsyncadd (!%p1384_p2), %s888_s30, 4294966784  ;;  %p22_p4 = scmp.ge.s32.totalorder %s1813_s22, 4   ;;  %s2022_s24 = smov %s1614_s25 }
 0x290   : > { %s2023_s25 = smov %s1618_s26  ;;  %s2024_s26 = smov %s1823_s18 }
 0x291   : > { %s2025_s27 = smov %s1813_s22  ;;  %24 = sbr.rel (!%p22_p4) target bundleno = 7 (0x7), region = 105 }
 0x298   :  { %893 = vsyncpa [#allocation3], 1 }
 0x299   :  { %895 = vsyncpa [#allocation3 + $0x1], 1 }
 0x29a   :  { %896 = vsyncpa [#allocation6], 1 }
 0x29b   :  { %897 = vsyncpa [#allocation9], 1 }
 0x29c   :  { %898 = vsyncpa [#allocation4], 1 }
 0x29d   :  { %900 = vsyncpa [#allocation4 + $0x1], 1 }

</bundles_post_ra>
